<compile_context>
chip_gen: v6e
topology: v6e:2x2x1
jax: 0.10.0
libtpu: 0.0.40
codegen_flags: <defaults>
</compile_context>

<pallas_src>
import jax
import jax.numpy as jnp
from jax.experimental import pallas as pl
from jax.experimental.pallas import tpu as pltpu


def _round_up(n, m):
    return ((n + m - 1) // m) * m


def mlp_kernel(x_ref, w0_ref, b0_ref, w1_ref, b1_ref, w2_ref, b2_ref, out_ref):
    # x tile: (TM, D_pad). Cast on the VMEM tile (no-op for f32 inputs).
    x = x_ref[...].astype(jnp.float32)

    # fc0 + ReLU  -> (TM, 128); padded lanes stay exactly 0 (zero weights/bias).
    h0 = jnp.dot(x, w0_ref[...], preferred_element_type=jnp.float32) + b0_ref[...]
    h0 = jnp.maximum(h0, 0.0)

    # dropout (eval -> identity), fc1 + ReLU -> (TM, 128)
    h1 = jnp.dot(h0, w1_ref[...], preferred_element_type=jnp.float32) + b1_ref[...]
    h1 = jnp.maximum(h1, 0.0)

    # dropout (eval -> identity), fc2 -> (TM, 10) exact logits (no pad lanes).
    logits = jnp.dot(h1, w2_ref[...], preferred_element_type=jnp.float32) + b2_ref[...]

    # Numerically stable log_softmax along dim=1.
    m = jnp.max(logits, axis=-1, keepdims=True)
    shifted = logits - m
    lse = jnp.log(jnp.sum(jnp.exp(shifted), axis=-1, keepdims=True))
    out_ref[...] = (shifted - lse).astype(out_ref.dtype)


def model_b_forward(x, params, image_size, tm=512):
    """x: any shape whose trailing dims flatten to image_size; returns (B, 10) log-probs."""
    w0, b0, w1, b1, w2, b2 = params
    D_pad = w0.shape[0]           # image_size rounded up to a multiple of 128
    H_pad = w0.shape[1]           # 128
    OUT = w2.shape[1]             # 10

    x2d = x.reshape(-1, image_size)
    B = x2d.shape[0]

    # Lane-align the feature dim (zero-pad; padded w0 rows are zero anyway).
    if D_pad != image_size:
        x2d = jnp.pad(x2d, ((0, 0), (0, D_pad - image_size)))

    # Batch tile: multiple of 8 sublanes, capped so small batches stay one tile.
    TM = min(tm, _round_up(B, 8))
    B_pad = _round_up(B, TM)
    if B_pad != B:
        x2d = jnp.pad(x2d, ((0, B_pad - B), (0, 0)))

    grid = (B_pad // TM,)

    const = lambda i: (0, 0)
    in_specs = [
        pl.BlockSpec((TM, D_pad), lambda i: (i, 0)),   # x: streamed per batch tile
        pl.BlockSpec((D_pad, H_pad), const),           # w0 (resident)
        pl.BlockSpec((1, H_pad), const),               # b0
        pl.BlockSpec((H_pad, H_pad), const),           # w1
        pl.BlockSpec((1, H_pad), const),               # b1
        pl.BlockSpec((H_pad, OUT), const),             # w2
        pl.BlockSpec((1, OUT), const),                 # b2
    ]
    out_spec = pl.BlockSpec((TM, OUT), lambda i: (i, 0))

    param_bytes = sum(int(p.size) * p.dtype.itemsize for p in params)
    cost = pl.CostEstimate(
        flops=2 * B_pad * (D_pad * H_pad + H_pad * H_pad + H_pad * OUT),
        transcendentals=B_pad * (OUT + 1),  # exp per logit + log per row
        bytes_accessed=int(x2d.size) * x2d.dtype.itemsize
        + param_bytes
        + B_pad * OUT * 4,
    )

    out = pl.pallas_call(
        mlp_kernel,
        out_shape=jax.ShapeDtypeStruct((B_pad, OUT), jnp.float32),
        grid=grid,
        in_specs=in_specs,
        out_specs=out_spec,
        compiler_params=pltpu.CompilerParams(
            dimension_semantics=("parallel",),
        ),
        cost_estimate=cost,
    )(x2d, w0, b0, w1, b1, w2, b2)

    return out[:B]


def init_params(key, image_size):
    """nn.Linear-style uniform(-1/sqrt(fan_in), 1/sqrt(fan_in)) init, zero-padded to
    lane/sublane-friendly shapes: (D_pad,128), (128,128), (128,10)."""
    D_pad = _round_up(image_size, 128)

    def linear(k, fan_in, fan_out, in_pad, out_pad):
        kw, kb = jax.random.split(k)
        bound = 1.0 / jnp.sqrt(jnp.float32(fan_in))
        w = jax.random.uniform(kw, (fan_in, fan_out), jnp.float32, -bound, bound)
        b = jax.random.uniform(kb, (1, fan_out), jnp.float32, -bound, bound)
        w_p = jnp.zeros((in_pad, out_pad), jnp.float32).at[:fan_in, :fan_out].set(w)
        b_p = jnp.zeros((1, out_pad), jnp.float32).at[:, :fan_out].set(b)
        return w_p, b_p

    k0, k1, k2 = jax.random.split(key, 3)
    w0, b0 = linear(k0, image_size, 100, D_pad, 128)
    w1, b1 = linear(k1, 100, 50, 128, 128)
    w2, b2 = linear(k2, 50, 10, 128, 10)
    return (w0, b0, w1, b1, w2, b2)


def reference_forward(x, params, image_size):
    """Pure-JAX reference (same padded params -> identical math)."""
    w0, b0, w1, b1, w2, b2 = params
    D_pad = w0.shape[0]
    x2d = x.reshape(-1, image_size).astype(jnp.float32)
    if D_pad != image_size:
        x2d = jnp.pad(x2d, ((0, 0), (0, D_pad - image_size)))
    h0 = jax.nn.relu(x2d @ w0 + b0)
    h1 = jax.nn.relu(h0 @ w1 + b1)
    return jax.nn.log_softmax(h1 @ w2 + b2, axis=-1)


if __name__ == "__main__":
    key = jax.random.PRNGKey(0)
    k_param, k_x = jax.random.split(key)

    # Small synthetic input: batch=8 grayscale 16x16 images -> image_size = 256.
    B, C, H, W = 8, 1, 16, 16
    image_size = C * H * W
    x = jax.random.normal(k_x, (B, C, H, W), jnp.float32)

    params = init_params(k_param, image_size)

    out = model_b_forward(x, params, image_size)
    out = jax.block_until_ready(out)

    assert out.shape == (B, 10), out.shape

    # log_softmax rows should (approximately) exponentiate-sum to 1
    row_sums = jnp.sum(jnp.exp(out), axis=-1)
    assert bool(jnp.all(jnp.abs(row_sums - 1.0) < 1e-4)), row_sums

    # Match pure-JAX reference
    ref = reference_forward(x, params, image_size)
    assert bool(jnp.all(jnp.abs(out - ref) < 1e-4)), jnp.max(jnp.abs(out - ref))

    print("KERNEL_OK")
</pallas_src>

<mosaic_0001>
module attributes {stable_mosaic.version = 11 : i64} {
  func.func @mlp_kernel(%arg0: i32, %arg1: memref<8x256xf32, #tpu.memory_space<vmem>>, %arg2: memref<256x128xf32, #tpu.memory_space<vmem>>, %arg3: memref<1x128xf32, #tpu.memory_space<vmem>>, %arg4: memref<128x128xf32, #tpu.memory_space<vmem>>, %arg5: memref<1x128xf32, #tpu.memory_space<vmem>>, %arg6: memref<128x10xf32, #tpu.memory_space<vmem>>, %arg7: memref<1x10xf32, #tpu.memory_space<vmem>>, %arg8: memref<8x10xf32, #tpu.memory_space<vmem>>) attributes {dimension_semantics = [#tpu.dimension_semantics<parallel>], iteration_bounds = array<i64: 1>, scalar_prefetch = 0 : i64, scratch_operands = 0 : i64, tpu.core_type = #tpu.core_type<tc>, window_params = [{transform_indices = @transform_0, window_bounds = array<i64: 8, 256>}, {pipeline_mode = #tpu.pipeline_mode<synchronous>, transform_indices = @transform_1, window_bounds = array<i64: 256, 128>}, {pipeline_mode = #tpu.pipeline_mode<synchronous>, transform_indices = @transform_2, window_bounds = array<i64: 1, 128>}, {pipeline_mode = #tpu.pipeline_mode<synchronous>, transform_indices = @transform_3, window_bounds = array<i64: 128, 128>}, {pipeline_mode = #tpu.pipeline_mode<synchronous>, transform_indices = @transform_4, window_bounds = array<i64: 1, 128>}, {pipeline_mode = #tpu.pipeline_mode<synchronous>, transform_indices = @transform_5, window_bounds = array<i64: 128, 10>}, {pipeline_mode = #tpu.pipeline_mode<synchronous>, transform_indices = @transform_6, window_bounds = array<i64: 1, 10>}, {transform_indices = @transform_7, window_bounds = array<i64: 8, 10>}]} {
    %c0 = arith.constant 0 : index
    %c0_0 = arith.constant 0 : index
    %0 = vector.load %arg1[%c0, %c0_0] : memref<8x256xf32, #tpu.memory_space<vmem>>, vector<8x256xf32>
    %c0_1 = arith.constant 0 : index
    %c0_2 = arith.constant 0 : index
    %1 = vector.load %arg2[%c0_1, %c0_2] : memref<256x128xf32, #tpu.memory_space<vmem>>, vector<256x128xf32>
    %cst = arith.constant dense<0.000000e+00> : vector<8x128xf32>
    %2 = tpu.matmul %0, %1, %cst {dimension_numbers = #tpu.dot_dimension_numbers<[1], [0], [0], [1], [0, 0, 1, 1], [], []>} : vector<8x256xf32>, vector<256x128xf32>, vector<8x128xf32> -> vector<8x128xf32>
    %c0_3 = arith.constant 0 : index
    %c0_4 = arith.constant 0 : index
    %3 = vector.load %arg3[%c0_3, %c0_4] : memref<1x128xf32, #tpu.memory_space<vmem>>, vector<1x128xf32>
    %4 = vector.broadcast %3 : vector<1x128xf32> to vector<8x128xf32>
    %5 = arith.addf %2, %4 : vector<8x128xf32>
    %cst_5 = arith.constant 0.000000e+00 : f32
    %6 = vector.broadcast %cst_5 : f32 to vector<8x128xf32>
    %7 = arith.maximumf %5, %6 : vector<8x128xf32>
    %c0_6 = arith.constant 0 : index
    %c0_7 = arith.constant 0 : index
    %8 = vector.load %arg4[%c0_6, %c0_7] : memref<128x128xf32, #tpu.memory_space<vmem>>, vector<128x128xf32>
    %cst_8 = arith.constant dense<0.000000e+00> : vector<8x128xf32>
    %9 = tpu.matmul %7, %8, %cst_8 {dimension_numbers = #tpu.dot_dimension_numbers<[1], [0], [0], [1], [0, 0, 1, 1], [], []>} : vector<8x128xf32>, vector<128x128xf32>, vector<8x128xf32> -> vector<8x128xf32>
    %c0_9 = arith.constant 0 : index
    %c0_10 = arith.constant 0 : index
    %10 = vector.load %arg5[%c0_9, %c0_10] : memref<1x128xf32, #tpu.memory_space<vmem>>, vector<1x128xf32>
    %11 = vector.broadcast %10 : vector<1x128xf32> to vector<8x128xf32>
    %12 = arith.addf %9, %11 : vector<8x128xf32>
    %cst_11 = arith.constant 0.000000e+00 : f32
    %13 = vector.broadcast %cst_11 : f32 to vector<8x128xf32>
    %14 = arith.maximumf %12, %13 : vector<8x128xf32>
    %c0_12 = arith.constant 0 : index
    %c0_13 = arith.constant 0 : index
    %15 = vector.load %arg6[%c0_12, %c0_13] : memref<128x10xf32, #tpu.memory_space<vmem>>, vector<128x10xf32>
    %cst_14 = arith.constant dense<0.000000e+00> : vector<8x10xf32>
    %16 = tpu.matmul %14, %15, %cst_14 {dimension_numbers = #tpu.dot_dimension_numbers<[1], [0], [0], [1], [0, 0, 1, 1], [], []>} : vector<8x128xf32>, vector<128x10xf32>, vector<8x10xf32> -> vector<8x10xf32>
    %c0_15 = arith.constant 0 : index
    %c0_16 = arith.constant 0 : index
    %17 = vector.load %arg7[%c0_15, %c0_16] : memref<1x10xf32, #tpu.memory_space<vmem>>, vector<1x10xf32>
    %18 = vector.broadcast %17 : vector<1x10xf32> to vector<8x10xf32>
    %19 = arith.addf %16, %18 : vector<8x10xf32>
    %cst_17 = arith.constant dense<0xFF800000> : vector<8xf32>
    %20 = vector.multi_reduction <maximumf>, %19, %cst_17 [1] : vector<8x10xf32> to vector<8xf32>
    %21 = vector.shape_cast %20 : vector<8xf32> to vector<8x1xf32>
    %22 = vector.broadcast %21 : vector<8x1xf32> to vector<8x10xf32>
    %23 = arith.subf %19, %22 : vector<8x10xf32>
    %24 = math.exp %23 : vector<8x10xf32>
    %cst_18 = arith.constant dense<0.000000e+00> : vector<8xf32>
    %25 = vector.multi_reduction <add>, %24, %cst_18 [1] : vector<8x10xf32> to vector<8xf32>
    %26 = vector.shape_cast %25 : vector<8xf32> to vector<8x1xf32>
    %27 = math.log %26 : vector<8x1xf32>
    %28 = vector.broadcast %27 : vector<8x1xf32> to vector<8x10xf32>
    %29 = arith.subf %23, %28 : vector<8x10xf32>
    %c0_19 = arith.constant 0 : index
    %c0_20 = arith.constant 0 : index
    %30 = vector.load %arg8[%c0_19, %c0_20] : memref<8x10xf32, #tpu.memory_space<vmem>>, vector<8x10xf32>
    tpu.vector_store %arg8[%c0_19, %c0_20], %29 {strides = array<i32>} : memref<8x10xf32, #tpu.memory_space<vmem>>, vector<8x10xf32>,
    return
  }
  func.func @transform_0(%arg0: i32) -> (i32, i32) {
    %c0_i32 = arith.constant 0 : i32
    %c0_i32_0 = arith.constant 0 : i32
    return %arg0, %c0_i32 : i32, i32
  }
  func.func @transform_1(%arg0: i32) -> (i32, i32) {
    %c0_i32 = arith.constant 0 : i32
    %c0_i32_0 = arith.constant 0 : i32
    %c0_i32_1 = arith.constant 0 : i32
    return %c0_i32, %c0_i32_0 : i32, i32
  }
  func.func @transform_2(%arg0: i32) -> (i32, i32) {
    %c0_i32 = arith.constant 0 : i32
    %c0_i32_0 = arith.constant 0 : i32
    %c0_i32_1 = arith.constant 0 : i32
    return %c0_i32, %c0_i32_0 : i32, i32
  }
  func.func @transform_3(%arg0: i32) -> (i32, i32) {
    %c0_i32 = arith.constant 0 : i32
    %c0_i32_0 = arith.constant 0 : i32
    %c0_i32_1 = arith.constant 0 : i32
    return %c0_i32, %c0_i32_0 : i32, i32
  }
  func.func @transform_4(%arg0: i32) -> (i32, i32) {
    %c0_i32 = arith.constant 0 : i32
    %c0_i32_0 = arith.constant 0 : i32
    %c0_i32_1 = arith.constant 0 : i32
    return %c0_i32, %c0_i32_0 : i32, i32
  }
  func.func @transform_5(%arg0: i32) -> (i32, i32) {
    %c0_i32 = arith.constant 0 : i32
    %c0_i32_0 = arith.constant 0 : i32
    %c0_i32_1 = arith.constant 0 : i32
    return %c0_i32, %c0_i32_0 : i32, i32
  }
  func.func @transform_6(%arg0: i32) -> (i32, i32) {
    %c0_i32 = arith.constant 0 : i32
    %c0_i32_0 = arith.constant 0 : i32
    %c0_i32_1 = arith.constant 0 : i32
    return %c0_i32, %c0_i32_0 : i32, i32
  }
  func.func @transform_7(%arg0: i32) -> (i32, i32) {
    %c0_i32 = arith.constant 0 : i32
    %c0_i32_0 = arith.constant 0 : i32
    return %arg0, %c0_i32 : i32, i32
  }
}

</mosaic_0001>

<bundles_post_ra>
// kernel: tpu_custom_call.1
= control target key start
LH: loop header
LB: loop body
LE: loop exit
PB: predicated region body
PF: predicated region fallthrough
CT: control target
= control target key end

     0   :  { %12 = vsyncpa [#allocation3], 0  ;;  %s765_s0 = inlined_call_operand.vmem [shape: f32[8,256], index: 0, kind: input, shape index: {}]   ;;  %s766_s1 = inlined_call_operand.hbm [shape: f32[256,128], index: 1, kind: input, shape index: {}]   ;;  %s767_s2 = inlined_call_operand.vmem [shape: f32[1,128], index: 2, kind: input, shape index: {}]   ;;  %s768_s3 = inlined_call_operand.vmem [shape: f32[128,128], index: 3, kind: input, shape index: {}]   ;;  %s769_s4 = inlined_call_operand.vmem [shape: f32[1,128], index: 4, kind: input, shape index: {}]   ;;  %s770_s5 = inlined_call_operand.vmem [shape: f32[128,10], index: 5, kind: input, shape index: {}]   ;;  %s771_s6 = inlined_call_operand.vmem [shape: f32[1,10], index: 6, kind: input, shape index: {}]   ;;  %s772_s7 = inlined_call_operand.hbm [shape: f32[8,10], index: 7, kind: output, shape index: {}]  }
   0x1   :  { %13 = vsyncpa [#allocation4], 0  ;;  %s565_s24 = smov [#allocation2]  }
   0x2   :  { %s21_s25 = sshll.u32 %s565_s24, 4  ;;  %s22_s25 = int_to_ptr.vmem [resolvable:$true] %s21_s25 }
   0x3   :  { %s529_s26 = scalar_lea.vmem %s22_s25, 4096  ;;  %p534_p1 = scmp.lt.s32.totalorder %s22_s25, %s22_s25 }
   0x4   :  { %p530_p0 = scmp.ne.s32.totalorder %s22_s25, %s529_s26  ;;  %p535_p2 = scmp.lt.s32.totalorder %s529_s26, %s529_s26 }
   0x6   :  { %p536_p3 = por %p535_p2, %p534_p1 }
   0x8   :  { %p537_p4 = pnand %p536_p3, %p530_p0 }
   0xa   :  { %540 = shalt.err (!%p537_p4)
}
   0xb   :  { %s566_s27 = smov 128   ;;  %s567_s28 = smov 8  }
   0xc   :  { %27 = dma.hbm_to_vmem [thread:$0]  %s766_s1, 4096, %s22_s25, [#allocation3], %s566_s27, %s566_s27, %s567_s28  }
   0xd   :  { %561 = dma.done.wait [#allocation3], 4096  }
   0xe   :  { %562 = vsyncadd [#allocation3], 4294963200  ;;  %v568_v0 = vmov 0.0   ;;  %v74_v1 = vld [vmem:[#allocation2 + $0xf8] sm:$0xff]  ;;  %v73_v3 = vld [vmem:[#allocation2 + $0xf0] sm:$0xff]  ;;  %vm569_vm0 = vmmov 0  }
   0xf   :  { %441 = vmatprep.subr.mxu1 %v568_v0  ;;  %v58_v2 = vld [vmem:[#allocation2 + $0x78] sm:$0xff]  ;;  %372 = vmatprep.subr.mxu0 %v74_v1  ;;  %v57_v4 = vld [vmem:[#allocation2 + $0x70] sm:$0xff]  ;;  %v72_v5 = vld [vmem:[#allocation2 + $0xe8] sm:$0xff]  ;;  %vm340_vm1 = vcmask 80896  }
  0x10   :  { %373 = vmatpush3.msra.mxu0 %v58_v2  ;;  %v56_v6 = vld [vmem:[#allocation2 + $0x68] sm:$0xff]  ;;  %v71_v7 = vld [vmem:[#allocation2 + $0xe0] sm:$0xff]  ;;  %v70_v9 = vld [vmem:[#allocation2 + $0xd8] sm:$0xff]  ;;  %473 = vmatprep.mubr.msk.f32.mxu1 %vm569_vm0, %v568_v0 }
  0x11   :  { %374 = vmatprep.subr.mxu0 %v73_v3  ;;  %v55_v8 = vld [vmem:[#allocation2 + $0x60] sm:$0xff]  ;;  %v54_v10 = vld [vmem:[#allocation2 + $0x58] sm:$0xff]  ;;  %v69_v11 = vld [vmem:[#allocation2 + $0xd0] sm:$0xff] }
  0x12   :  { %375 = vmatpush3.msra.mxu0 %v57_v4  ;;  %v53_v12 = vld [vmem:[#allocation2 + $0x50] sm:$0xff]  ;;  %v68_v13 = vld [vmem:[#allocation2 + $0xc8] sm:$0xff]  ;;  %v168_v16 = vld [vmem:[%s768_s3 + $0x78] sm:$0xff] }
  0x13   :  { %376 = vmatprep.subr.mxu0 %v72_v5  ;;  %v42_v14 = vld [vmem:[%s765_s0 + $0x8] sm:$0xff]  ;;  %v167_v17 = vld [vmem:[%s768_s3 + $0x70] sm:$0xff]  ;;  %v67_v18 = vld [vmem:[#allocation2 + $0xc0] sm:$0xff]  ;;  %442 = vmatpush3.msra.mxu1 %v168_v16 }
  0x14   :  { %377 = vmatpush3.msra.mxu0 %v56_v6  ;;  %v52_v15 = vld [vmem:[#allocation2 + $0x48] sm:$0xff]  ;;  %146 = vmatprep.mubr.f32.mxu0 %v42_v14  ;;  %v51_v19 = vld [vmem:[#allocation2 + $0x40] sm:$0xff]  ;;  %v66_v21 = vld [vmem:[#allocation2 + $0xb8] sm:$0xff] }
  0x15   :  { %378 = vmatprep.subr.mxu0 %v71_v7  ;;  %443 = vmatprep.subr.mxu1 %v568_v0  ;;  %v166_v20 = vld [vmem:[%s768_s3 + $0x68] sm:$0xff]  ;;  %v50_v22 = vld [vmem:[#allocation2 + $0x38] sm:$0xff]  ;;  %v165_v23 = vld [vmem:[%s768_s3 + $0x60] sm:$0xff] }
  0x16   :  { %379 = vmatpush3.msra.mxu0 %v55_v8  ;;  %444 = vmatpush3.msra.mxu1 %v167_v17  ;;  %v65_v24 = vld [vmem:[#allocation2 + $0xb0] sm:$0xff]  ;;  %v164_v26 = vld [vmem:[%s768_s3 + $0x58] sm:$0xff]  ;;  %v64_v27 = vld [vmem:[#allocation2 + $0xa8] sm:$0xff] }
  0x17   :  { %380 = vmatprep.subr.mxu0 %v70_v9  ;;  %445 = vmatprep.subr.mxu1 %v568_v0  ;;  %v49_v25 = vld [vmem:[#allocation2 + $0x30] sm:$0xff]  ;;  %v48_v28 = vld [vmem:[#allocation2 + $0x28] sm:$0xff]  ;;  %v63_v30 = vld [vmem:[#allocation2 + $0xa0] sm:$0xff] }
  0x18   :  { %381 = vmatpush3.msra.mxu0 %v54_v10  ;;  %446 = vmatpush3.msra.mxu1 %v166_v20  ;;  %v163_v29 = vld [vmem:[%s768_s3 + $0x50] sm:$0xff]  ;;  %v47_v31 = vld [vmem:[#allocation2 + $0x20] sm:$0xff]  ;;  %v162_v32 = vld [vmem:[%s768_s3 + $0x48] sm:$0xff] }
  0x19   :  { %382 = vmatprep.subr.mxu0 %v69_v11  ;;  %447 = vmatprep.subr.mxu1 %v568_v0  ;;  %v62_v33 = vld [vmem:[#allocation2 + $0x98] sm:$0xff]  ;;  %v161_v35 = vld [vmem:[%s768_s3 + $0x40] sm:$0xff]  ;;  %v61_v36 = vld [vmem:[#allocation2 + $0x90] sm:$0xff] }
  0x1a   :  { %383 = vmatpush3.msra.mxu0 %v53_v12  ;;  %448 = vmatpush3.msra.mxu1 %v165_v23  ;;  %v46_v34 = vld [vmem:[#allocation2 + $0x18] sm:$0xff]  ;;  %v45_v37 = vld [vmem:[#allocation2 + $0x10] sm:$0xff]  ;;  %v60_v39 = vld [vmem:[#allocation2 + $0x88] sm:$0xff] }
  0x1b   :  { %384 = vmatprep.subr.mxu0 %v68_v13  ;;  %449 = vmatprep.subr.mxu1 %v568_v0  ;;  %v160_v38 = vld [vmem:[%s768_s3 + $0x38] sm:$0xff]  ;;  %v44_v40 = vld [vmem:[#allocation2 + $0x8] sm:$0xff]  ;;  %v159_v41 = vld [vmem:[%s768_s3 + $0x30] sm:$0xff] }
  0x1c   :  { %385 = vmatpush3.msra.mxu0 %v52_v15  ;;  %450 = vmatpush3.msra.mxu1 %v164_v26  ;;  %v59_v42 = vld [vmem:[#allocation2 + $0x80] sm:$0xff]  ;;  %v158_v44 = vld [vmem:[%s768_s3 + $0x28] sm:$0xff]  ;;  %v156_v47 = vld [vmem:[%s768_s3 + $0x18] sm:$0xff] }
  0x1d   :  { %386 = vmatprep.subr.mxu0 %v67_v18  ;;  %451 = vmatprep.subr.mxu1 %v568_v0  ;;  %v43_v43 = vld [vmem:[#allocation2] sm:$0xff]  ;;  %v155_v48 = vld [vmem:[%s768_s3 + $0x10] sm:$0xff]  ;;  %v154_v49 = vld [vmem:[%s768_s3 + $0x8] sm:$0xff] }
  0x1e   :  { %387 = vmatpush3.msra.mxu0 %v51_v19  ;;  %452 = vmatpush3.msra.mxu1 %v163_v29  ;;  %v41_v45 = vld [vmem:[%s765_s0] sm:$0xff]  ;;  %v262_v51 = vld [vmem:[%s770_s5 + $0x78] sm:$0xff]  ;;  %v261_v52 = vld [vmem:[%s770_s5 + $0x70] sm:$0xff] }
  0x1f   :  { %388 = vmatprep.subr.mxu0 %v66_v21  ;;  %453 = vmatprep.subr.mxu1 %v568_v0  ;;  %v157_v46 = vld [vmem:[%s768_s3 + $0x20] sm:$0xff]  ;;  %v260_v53 = vld [vmem:[%s770_s5 + $0x68] sm:$0xff]  ;;  %v258_v55 = vld [vmem:[%s770_s5 + $0x58] sm:$0xff] }
  0x20   :  { %389 = vmatpush3.msra.mxu0 %v50_v22  ;;  %454 = vmatpush3.msra.mxu1 %v162_v32  ;;  %v153_v50 = vld [vmem:[%s768_s3] sm:$0xff]  ;;  %v257_v56 = vld [vmem:[%s770_s5 + $0x50] sm:$0xff]  ;;  %v256_v57 = vld [vmem:[%s770_s5 + $0x48] sm:$0xff] }
  0x21   :  { %390 = vmatprep.subr.mxu0 %v65_v24  ;;  %455 = vmatprep.subr.mxu1 %v568_v0  ;;  %v259_v54 = vld [vmem:[%s770_s5 + $0x60] sm:$0xff]  ;;  %v254_v59 = vld [vmem:[%s770_s5 + $0x38] sm:$0xff]  ;;  %v253_v60 = vld [vmem:[%s770_s5 + $0x30] sm:$0xff] }
  0x22   :  { %391 = vmatpush3.msra.mxu0 %v49_v25  ;;  %456 = vmatpush3.msra.mxu1 %v161_v35  ;;  %v255_v58 = vld [vmem:[%s770_s5 + $0x40] sm:$0xff]  ;;  %v252_v61 = vld [vmem:[%s770_s5 + $0x28] sm:$0xff]  ;;  %v250_v63 = vld [vmem:[%s770_s5 + $0x18] sm:$0xff] }
  0x23   :  { %392 = vmatprep.subr.mxu0 %v64_v27  ;;  %457 = vmatprep.subr.mxu1 %v568_v0  ;;  %v251_v62 = vld [vmem:[%s770_s5 + $0x20] sm:$0xff]  ;;  %v249_v7 = vld [vmem:[%s770_s5 + $0x10] sm:$0xff]  ;;  %v248_v8 = vld [vmem:[%s770_s5 + $0x8] sm:$0xff] }
  0x24   :  { %393 = vmatpush3.msra.mxu0 %v48_v28  ;;  %458 = vmatpush3.msra.mxu1 %v160_v38  ;;  %v369_v2 = vld [vmem:[%s767_s2] ss:$0 sm:$0xff] }
  0x25   :  { %394 = vmatprep.subr.mxu0 %v63_v30  ;;  %459 = vmatprep.subr.mxu1 %v568_v0  ;;  %v247_v9 = vld [vmem:[%s770_s5] sm:$0xff] }
  0x26   :  { %395 = vmatpush3.msra.mxu0 %v47_v31  ;;  %460 = vmatpush3.msra.mxu1 %v159_v41  ;;  %v370_v10 = vld [vmem:[%s769_s4] ss:$0 sm:$0xff]  ;;  %s570_s4 = smov [#allocation5]  }
  0x27   :  { %396 = vmatprep.subr.mxu0 %v62_v33  ;;  %461 = vmatprep.subr.mxu1 %v568_v0  ;;  %v371_v15 = vld [vmem:[%s771_s6] ss:$0 sm:$0xff]  ;;  %s360_s5 = sshll.u32 %s570_s4, 4  ;;  %s361_s5 = int_to_ptr.vmem [resolvable:$true] %s360_s5 }
  0x28   :  { %397 = vmatpush3.msra.mxu0 %v46_v34  ;;  %462 = vmatpush3.msra.mxu1 %v158_v44  ;;  %s541_s6 = scalar_lea.vmem %s361_s5, 128  ;;  %p546_p6 = scmp.lt.s32.totalorder %s361_s5, %s361_s5 }
  0x29   :  { %398 = vmatprep.subr.mxu0 %v61_v36  ;;  %463 = vmatprep.subr.mxu1 %v568_v0  ;;  %p542_p5 = scmp.ne.s32.totalorder %s361_s5, %s541_s6  ;;  %p547_p7 = scmp.lt.s32.totalorder %s541_s6, %s541_s6 }
  0x2a   :  { %399 = vmatpush3.msra.mxu0 %v45_v37  ;;  %464 = vmatpush3.msra.mxu1 %v157_v46 }
  0x2b   :  { %400 = vmatprep.subr.mxu0 %v60_v39  ;;  %465 = vmatprep.subr.mxu1 %v568_v0  ;;  %p548_p8 = por %p547_p7, %p546_p6 }
  0x2c   :  { %401 = vmatpush3.msra.mxu0 %v44_v40  ;;  %466 = vmatpush3.msra.mxu1 %v156_v47 }
  0x2d   :  { %402 = vmatprep.subr.mxu0 %v59_v42  ;;  %467 = vmatprep.subr.mxu1 %v568_v0  ;;  %p549_p9 = pnand %p548_p8, %p542_p5 }
  0x2e   :  { %403 = vmatpush3.msra.mxu0 %v43_v43  ;;  %468 = vmatpush3.msra.mxu1 %v155_v48 }
  0x2f   :  { %147 = vmatmul.mubr.f32.vlgmr.msra.gmra.mxu0 %v41_v45  ;;  %476 = vmatprep.subr.mxu0 %v568_v0 }
  0x30   :  { %469 = vmatprep.subr.mxu1 %v568_v0  ;;  %508 = vmatprep.mubr.msk.f32.mxu0 %vm569_vm0, %v568_v0 }
  0x31   :  { %470 = vmatpush3.msra.mxu1 %v154_v49  ;;  %477 = vmatpush3.msra.mxu0 %v262_v51 }
  0x32   :  { %471 = vmatprep.subr.mxu1 %v568_v0  ;;  %478 = vmatprep.subr.mxu0 %v568_v0 }
  0x33   :  { %472 = vmatpush3.msra.mxu1 %v153_v50  ;;  %479 = vmatpush3.msra.mxu0 %v261_v52 }
  0x34   :  { %480 = vmatprep.subr.mxu0 %v568_v0 }
  0x35   :  { %481 = vmatpush3.msra.mxu0 %v260_v53 }
  0x36   :  { %482 = vmatprep.subr.mxu0 %v568_v0 }
  0x37   :  { %483 = vmatpush3.msra.mxu0 %v259_v54 }
  0x38   :  { %484 = vmatprep.subr.mxu0 %v568_v0 }
  0x39   :  { %485 = vmatpush3.msra.mxu0 %v258_v55 }
  0x3a   :  { %486 = vmatprep.subr.mxu0 %v568_v0 }
  0x3b   :  { %487 = vmatpush3.msra.mxu0 %v257_v56 }
  0x3c   :  { %488 = vmatprep.subr.mxu0 %v568_v0 }
  0x3d   :  { %489 = vmatpush3.msra.mxu0 %v256_v57 }
  0x3e   :  { %490 = vmatprep.subr.mxu0 %v568_v0 }
  0x3f   :  { %491 = vmatpush3.msra.mxu0 %v255_v58 }
  0x40   :  { %492 = vmatprep.subr.mxu0 %v568_v0 }
  0x41   :  { %493 = vmatpush3.msra.mxu0 %v254_v59 }
  0x42   :  { %494 = vmatprep.subr.mxu0 %v568_v0 }
  0x43   :  { %495 = vmatpush3.msra.mxu0 %v253_v60 }
  0x44   :  { %496 = vmatprep.subr.mxu0 %v568_v0 }
  0x45   :  { %497 = vmatpush3.msra.mxu0 %v252_v61 }
  0x46   :  { %498 = vmatprep.subr.mxu0 %v568_v0 }
  0x47   :  { %499 = vmatpush3.msra.mxu0 %v251_v62 }
  0x48   :  { %500 = vmatprep.subr.mxu0 %v568_v0 }
  0x49   :  { %501 = vmatpush3.msra.mxu0 %v250_v63 }
  0x4a   :  { %502 = vmatprep.subr.mxu0 %v568_v0 }
  0x4b   :  { %503 = vmatpush3.msra.mxu0 %v249_v7 }
  0x4c   :  { %504 = vmatprep.subr.mxu0 %v568_v0 }
  0x4d   :  { %505 = vmatpush3.msra.mxu0 %v248_v8 }
  0x4e   :  { %506 = vmatprep.subr.mxu0 %v568_v0 }
  0x4f   :  { %507 = vmatpush3.msra.mxu0 %v247_v9 }
  0xef   :  { %v404_v1 = vpop.f32.mrf.mxu0 }
  0xf1   :  { %v405_v3 = vpop.f32.mrf.mxu0 }
  0xf2   :  { %v406_v4 = vadd.f32 %v405_v3, %v404_v1 }
  0xf4   :  { %v149_v5 = vadd.f32 %v406_v4, %v369_v2 }
  0xf6   :  { %v152_v6 = vmax.f32 %v149_v5, 0.0 }
  0xf8   :  { %474 = vmatmul.mubr.f32.vlgmr.msra.gmra.mxu1 %v152_v6 }
 0x1b8   :  { %v242_v11 = vpop.f32.mrf.mxu1 }
 0x1b9   :  { %v243_v12 = vadd.f32 %v370_v10, %v242_v11 }
 0x1ba   :  { %v475_v13 = vpop.f32.mrf.mxu1 }
 0x1bb   :  { %v246_v14 = vmax.f32 %v243_v12, 0.0 }
 0x1bd   :  { %509 = vmatmul.mubr.f32.vlgmr.msra.gmra.mxu0 %v246_v14 }
 0x27d   :  { %v336_v16 = vpop.f32.mrf.mxu0 }
 0x27e   :  { %v337_v0 = vadd.f32 %v371_v15, %v336_v16 }
 0x27f   :  { %v510_v17 = vpop.f32.mrf.mxu0 }
 0x280   :  { %v341_v18 = vsel %vm340_vm1, %v337_v0, -inf }
 0x281   :  { %342 = vmax.xlane.f32.xlu0 %v341_v18 }
 0x30a   :  { %v343_v19 = vpop.xlane.xlu0 %342 }
 0x30b   :  { %v344_v20 = vsub.f32 %v337_v0, %v343_v19 }
 0x30d   :  { %v345_v21 = vmul.f32 1.442695, %v344_v20 }
 0x30f   :  { %517 = vpow2.f32 %v345_v21 }
 0x31c   :  { %v518_v22 = vpop.eup %517 }
 0x31d   :  { %v347_v23 = vsel %vm340_vm1, %v518_v22, 0.0 }
 0x31e   :  { %348 = vadd.xlane.f32.xlu0 %v347_v23 }
 0x3a7   :  { %v349_v24 = vpop.xlane.xlu0 %348 }
 0x3a8   :  { %519 = vlog2.f32 %v349_v24 }
 0x3b5   :  { %v520_v25 = vpop.eup %519 }
 0x3b6   :  { %v351_v26 = vmul.f32 0.6931472, %v520_v25 }
 0x3b8   :  { %v352_v27 = vsub.f32 %v344_v20, %v351_v26 }
 0x3ba   :  { %353 = vst.msk [vmem:[#allocation5] sm:$0xff] %vm340_vm1, %v352_v27 }
 0x3bb   :  { %552 = shalt.err (!%p549_p9)
}
 0x3bc   :  { %363 = dma.vmem_to_hbm [thread:$0]  %s361_s5, 128, %s772_s7, [#allocation4]  }
 0x3bd   :  { %563 = dma.done.wait [#allocation4], 128  }
 0x3be   :  { %564 = vsyncadd [#allocation4], 4294967168 }
 0x3bf   :  { %367 = vsyncpa [#allocation3], 1 }
 0x3c0   :  { %368 = vsyncpa [#allocation4], 1 }

</bundles_post_ra>
